<compile_context>
chip_gen: v6e
topology: v6e:2x2x1
jax: 0.10.0
libtpu: 0.0.40
codegen_flags: <defaults>
</compile_context>

<pallas_src>
import jax
import jax.numpy as jnp
from jax.experimental import pallas as pl
from jax.experimental.pallas import tpu as pltpu


def _cdiv(a, b):
    return -(-a // b)


def custom_loss(output, actions, target, unit_cost, *, tile_max=65536):
    """output, actions: (B, N); target: (B,); unit_cost: scalar or (N,)."""
    B, N = output.shape

    # ---- tile selection: big lane tiles, padding waste bounded to <128 cols/tile
    tile_max = max(128, (int(tile_max) // 128) * 128)
    n_tiles = _cdiv(B, tile_max)
    tile_b = min(tile_max, max(128, _cdiv(_cdiv(B, n_tiles), 128) * 128))
    n_valid = _cdiv(B, tile_b)                 # tiles that actually contain data
    n_cores = 2 if n_valid >= 2 else 1         # megacore split (v7x); harmless on 1-TC chips
    spc = _cdiv(n_valid, n_cores)              # grid steps per core

    # ---- layout plumbing (no pads, no dtype copies; transposes fuse upstream under jit)
    pred_t = output.T                          # (N, B), native dtype
    act_t = actions.T                          # (N, B), native dtype
    tgt = target.reshape(1, B)                 # free reshape
    uc = jnp.broadcast_to(
        jnp.asarray(unit_cost, jnp.float32).reshape(-1), (N,)).reshape(N, 1)

    def kernel(uc_ref, pred_ref, act_ref, tgt_ref, out_ref, acc_ref):
        c = pl.program_id(0)                   # core (parallel axis)
        i = pl.program_id(1)                   # batch-tile step (reduction axis)

        @pl.when(i == 0)
        def _():
            acc_ref[...] = jnp.zeros_like(acc_ref)

        pred = pred_ref[...].astype(jnp.float32)           # (N, tile_b)
        act = act_ref[...].astype(jnp.float32)              # (N, tile_b)
        per_item = jnp.maximum(pred - act, 0.0) + uc_ref[...] * act
        cost = jnp.sum(per_item, axis=0, keepdims=True)     # (1, tile_b) sublane reduce
        err = jnp.abs(cost - tgt_ref[...].astype(jnp.float32))

        # Mask columns past the true batch (partial / fully-overrun tail tiles).
        col = (c * spc + i) * tile_b + jax.lax.broadcasted_iota(
            jnp.int32, (1, tile_b), 1)
        err = jnp.where(col < B, err, 0.0)

        acc_ref[...] += jnp.sum(err, axis=1, keepdims=True)  # (1, 1)

        @pl.when(i == spc - 1)
        def _():
            out_ref[...] = jnp.broadcast_to(acc_ref[...], (1, 128))

    def col_map(c, i):
        # Clamp so a fully-overrun tile (odd tile count split over 2 cores) still
        # points at valid HBM; its contribution is zeroed by the mask above.
        return (0, jnp.minimum(c * spc + i, n_valid - 1))

    itemsize = jnp.dtype(output.dtype).itemsize
    partials = pl.pallas_call(
        kernel,
        out_shape=jax.ShapeDtypeStruct((1, n_cores * 128), jnp.float32),
        grid=(n_cores, spc),
        in_specs=[
            pl.BlockSpec((N, 1), lambda c, i: (0, 0)),       # unit_cost (resident)
            pl.BlockSpec((N, tile_b), col_map),              # output^T  (streamed)
            pl.BlockSpec((N, tile_b), col_map),              # actions^T (streamed)
            pl.BlockSpec((1, tile_b), col_map),              # target    (streamed)
        ],
        out_specs=pl.BlockSpec((1, 128), lambda c, i: (0, c)),
        scratch_shapes=[pltpu.VMEM((1, 1), jnp.float32)],
        compiler_params=pltpu.CompilerParams(
            dimension_semantics=("parallel", "arbitrary"),
            vmem_limit_bytes=32 * 1024 * 1024,
        ),
        cost_estimate=pl.CostEstimate(
            flops=int(B * (5 * N + 3)),
            bytes_accessed=int(itemsize * (2 * B * N) + 4 * B + 4 * N),
            transcendentals=0,
        ),
    )(uc, pred_t, act_t, tgt)

    partials = partials.reshape(n_cores, 128)[:, 0]          # per-core partial sums
    return jnp.sum(partials) * (1.0 / B)


def custom_loss_ref(output, actions, target, unit_cost):
    cost = jnp.sum(jnp.maximum(output - actions, 0.0) + unit_cost * actions, axis=1)
    return jnp.mean(jnp.abs(cost - target))


if __name__ == "__main__":
    key = jax.random.PRNGKey(0)
    k1, k2, k3 = jax.random.split(key, 3)

    B, N = 1000, 5        # not a multiple of 128 -> exercises in-kernel tail masking
    output = jax.random.normal(k1, (B, N), dtype=jnp.float32)
    actions = jax.random.uniform(k2, (B, N), dtype=jnp.float32)
    target = jax.random.normal(k3, (B,), dtype=jnp.float32)
    unit_cost = jnp.float32(0.3)

    ref = custom_loss_ref(output, actions, target, unit_cost)

    # Small tiles: multi-step grid, 2-way parallel split, clamped + masked tail tile.
    loss_small = jax.jit(
        lambda o, a, t, u: custom_loss(o, a, t, u, tile_max=256)
    )(output, actions, target, unit_cost)

    # Default tiles: single resident tile, single core, masked tail only.
    loss_big = jax.jit(custom_loss)(output, actions, target, unit_cost)

    loss_small, loss_big = jax.block_until_ready((loss_small, loss_big))

    assert loss_small.shape == (), loss_small.shape
    assert loss_big.shape == (), loss_big.shape
    assert jnp.allclose(loss_small, ref, atol=1e-5, rtol=1e-4), (
        float(loss_small), float(ref))
    assert jnp.allclose(loss_big, ref, atol=1e-5, rtol=1e-4), (
        float(loss_big), float(ref))

    print("KERNEL_OK")
</pallas_src>

<mosaic_0001>
module attributes {stable_mosaic.version = 11 : i64} {
  func.func @kernel(%arg0: i32, %arg1: i32, %arg2: memref<5x1xf32, #tpu.memory_space<vmem>>, %arg3: memref<5x256xf32, #tpu.memory_space<vmem>>, %arg4: memref<5x256xf32, #tpu.memory_space<vmem>>, %arg5: memref<1x256xf32, #tpu.memory_space<vmem>>, %arg6: memref<1x128xf32, #tpu.memory_space<vmem>>, %arg7: memref<1x1xf32, #tpu.memory_space<vmem>>) attributes {dimension_semantics = [#tpu.dimension_semantics<parallel>, #tpu.dimension_semantics<arbitrary>], iteration_bounds = array<i64: 2, 2>, scalar_prefetch = 0 : i64, scratch_operands = 1 : i64, tpu.core_type = #tpu.core_type<tc>, window_params = [{pipeline_mode = #tpu.pipeline_mode<synchronous>, transform_indices = @transform_0, window_bounds = array<i64: 5, 1>}, {transform_indices = @transform_1, window_bounds = array<i64: 5, 256>}, {transform_indices = @transform_2, window_bounds = array<i64: 5, 256>}, {transform_indices = @transform_3, window_bounds = array<i64: 1, 256>}, {transform_indices = @transform_4, window_bounds = array<i64: 1, 128>}]} {
    %c0_i32 = arith.constant 0 : i32
    %0 = arith.cmpi eq, %arg1, %c0_i32 : i32
    %1 = arith.extui %0 : i1 to i32
    %c0_i32_0 = arith.constant 0 : i32
    %2 = arith.cmpi ne, %1, %c0_i32_0 : i32
    scf.if %2 {
      %cst_16 = arith.constant 0.000000e+00 : f32
      %35 = vector.broadcast %cst_16 : f32 to vector<1x1xf32>
      %c0_17 = arith.constant 0 : index
      %c0_18 = arith.constant 0 : index
      %36 = vector.load %arg7[%c0_17, %c0_18] : memref<1x1xf32, #tpu.memory_space<vmem>>, vector<1x1xf32>
      tpu.vector_store %arg7[%c0_17, %c0_18], %35 {strides = array<i32>} : memref<1x1xf32, #tpu.memory_space<vmem>>, vector<1x1xf32>,
    } else {
    }
    %c0 = arith.constant 0 : index
    %c0_1 = arith.constant 0 : index
    %3 = vector.load %arg3[%c0, %c0_1] : memref<5x256xf32, #tpu.memory_space<vmem>>, vector<5x256xf32>
    %c0_2 = arith.constant 0 : index
    %c0_3 = arith.constant 0 : index
    %4 = vector.load %arg4[%c0_2, %c0_3] : memref<5x256xf32, #tpu.memory_space<vmem>>, vector<5x256xf32>
    %5 = arith.subf %3, %4 : vector<5x256xf32>
    %cst = arith.constant 0.000000e+00 : f32
    %6 = vector.broadcast %cst : f32 to vector<5x256xf32>
    %7 = arith.maximumf %5, %6 : vector<5x256xf32>
    %c0_4 = arith.constant 0 : index
    %c0_5 = arith.constant 0 : index
    %8 = vector.load %arg2[%c0_4, %c0_5] : memref<5x1xf32, #tpu.memory_space<vmem>>, vector<5x1xf32>
    %9 = vector.broadcast %8 : vector<5x1xf32> to vector<5x256xf32>
    %10 = arith.mulf %9, %4 : vector<5x256xf32>
    %11 = arith.addf %7, %10 : vector<5x256xf32>
    %cst_6 = arith.constant dense<0.000000e+00> : vector<256xf32>
    %12 = vector.multi_reduction <add>, %11, %cst_6 [0] : vector<5x256xf32> to vector<256xf32>
    %13 = vector.shape_cast %12 : vector<256xf32> to vector<1x256xf32>
    %c0_7 = arith.constant 0 : index
    %c0_8 = arith.constant 0 : index
    %14 = vector.load %arg5[%c0_7, %c0_8] : memref<1x256xf32, #tpu.memory_space<vmem>>, vector<1x256xf32>
    %15 = arith.subf %13, %14 : vector<1x256xf32>
    %16 = math.absf %15 : vector<1x256xf32>
    %c2_i32 = arith.constant 2 : i32
    %17 = arith.muli %arg0, %c2_i32 : i32
    %18 = arith.addi %17, %arg1 : i32
    %c256_i32 = arith.constant 256 : i32
    %19 = arith.muli %18, %c256_i32 : i32
    %20 = tpu.iota {dimensions = array<i32: 1>} : vector<1x256xi32>
    %21 = vector.broadcast %19 : i32 to vector<1x256xi32>
    %22 = arith.addi %21, %20 : vector<1x256xi32>
    %c1000_i32 = arith.constant 1000 : i32
    %23 = vector.broadcast %c1000_i32 : i32 to vector<1x256xi32>
    %24 = arith.cmpi slt, %22, %23 : vector<1x256xi32>
    %cst_9 = arith.constant 0.000000e+00 : f32
    %25 = vector.broadcast %cst_9 : f32 to vector<1x256xf32>
    %26 = arith.select %24, %16, %25 : vector<1x256xi1>, vector<1x256xf32>
    %c0_10 = arith.constant 0 : index
    %c0_11 = arith.constant 0 : index
    %27 = vector.load %arg7[%c0_10, %c0_11] : memref<1x1xf32, #tpu.memory_space<vmem>>, vector<1x1xf32>
    %cst_12 = arith.constant dense<0.000000e+00> : vector<1xf32>
    %28 = vector.multi_reduction <add>, %26, %cst_12 [1] : vector<1x256xf32> to vector<1xf32>
    %29 = vector.shape_cast %28 : vector<1xf32> to vector<1x1xf32>
    %30 = arith.addf %27, %29 : vector<1x1xf32>
    %c0_13 = arith.constant 0 : index
    %c0_14 = arith.constant 0 : index
    %31 = vector.load %arg7[%c0_13, %c0_14] : memref<1x1xf32, #tpu.memory_space<vmem>>, vector<1x1xf32>
    tpu.vector_store %arg7[%c0_13, %c0_14], %30 {strides = array<i32>} : memref<1x1xf32, #tpu.memory_space<vmem>>, vector<1x1xf32>,
    %c1_i32 = arith.constant 1 : i32
    %32 = arith.cmpi eq, %arg1, %c1_i32 : i32
    %33 = arith.extui %32 : i1 to i32
    %c0_i32_15 = arith.constant 0 : i32
    %34 = arith.cmpi ne, %33, %c0_i32_15 : i32
    scf.if %34 {
      %c0_16 = arith.constant 0 : index
      %c0_17 = arith.constant 0 : index
      %35 = vector.load %arg7[%c0_16, %c0_17] : memref<1x1xf32, #tpu.memory_space<vmem>>, vector<1x1xf32>
      %36 = vector.shape_cast %35 : vector<1x1xf32> to vector<1x1xf32>
      %37 = vector.broadcast %36 : vector<1x1xf32> to vector<1x128xf32>
      %c0_18 = arith.constant 0 : index
      %c0_19 = arith.constant 0 : index
      %38 = vector.load %arg6[%c0_18, %c0_19] : memref<1x128xf32, #tpu.memory_space<vmem>>, vector<1x128xf32>
      tpu.vector_store %arg6[%c0_18, %c0_19], %37 {strides = array<i32>} : memref<1x128xf32, #tpu.memory_space<vmem>>, vector<1x128xf32>,
    } else {
    }
    return
  }
  func.func @transform_0(%arg0: i32, %arg1: i32) -> (i32, i32) {
    %c0_i32 = arith.constant 0 : i32
    %c0_i32_0 = arith.constant 0 : i32
    %c0_i32_1 = arith.constant 0 : i32
    return %c0_i32, %c0_i32_0 : i32, i32
  }
  func.func @transform_1(%arg0: i32, %arg1: i32) -> (i32, i32) {
    %c2_i32 = arith.constant 2 : i32
    %0 = arith.muli %arg0, %c2_i32 : i32
    %1 = arith.addi %0, %arg1 : i32
    %c3_i32 = arith.constant 3 : i32
    %2 = arith.minsi %1, %c3_i32 : i32
    %c0_i32 = arith.constant 0 : i32
    %c0_i32_0 = arith.constant 0 : i32
    return %c0_i32, %2 : i32, i32
  }
  func.func @transform_2(%arg0: i32, %arg1: i32) -> (i32, i32) {
    %c2_i32 = arith.constant 2 : i32
    %0 = arith.muli %arg0, %c2_i32 : i32
    %1 = arith.addi %0, %arg1 : i32
    %c3_i32 = arith.constant 3 : i32
    %2 = arith.minsi %1, %c3_i32 : i32
    %c0_i32 = arith.constant 0 : i32
    %c0_i32_0 = arith.constant 0 : i32
    return %c0_i32, %2 : i32, i32
  }
  func.func @transform_3(%arg0: i32, %arg1: i32) -> (i32, i32) {
    %c2_i32 = arith.constant 2 : i32
    %0 = arith.muli %arg0, %c2_i32 : i32
    %1 = arith.addi %0, %arg1 : i32
    %c3_i32 = arith.constant 3 : i32
    %2 = arith.minsi %1, %c3_i32 : i32
    %c0_i32 = arith.constant 0 : i32
    %c0_i32_0 = arith.constant 0 : i32
    return %c0_i32, %2 : i32, i32
  }
  func.func @transform_4(%arg0: i32, %arg1: i32) -> (i32, i32) {
    %c0_i32 = arith.constant 0 : i32
    %c0_i32_0 = arith.constant 0 : i32
    return %c0_i32, %arg0 : i32, i32
  }
}

</mosaic_0001>

<bundles_post_ra>
// kernel: _lambda_.1
= control target key start
LH: loop header
LB: loop body
LE: loop exit
PB: predicated region body
PF: predicated region fallthrough
CT: control target
= control target key end

     0   :  { %s994_s0 = inlined_call_operand.vmem [shape: f32[5,1], index: 0, kind: input, shape index: {}]   ;;  %s995_s1 = inlined_call_operand.hbm [shape: f32[5,1000], index: 1, kind: input, shape index: {}]   ;;  %s996_s2 = inlined_call_operand.hbm [shape: f32[5,1000], index: 2, kind: input, shape index: {}]   ;;  %s997_s3 = inlined_call_operand.vmem [shape: f32[1,1000], index: 3, kind: input, shape index: {}]   ;;  %s998_s4 = inlined_call_operand.vmem [shape: f32[1,256], index: 4, kind: output, shape index: {}]  }
   0x1   :  { %999 = sst [smem:[#allocation9_spill]] %s995_s1 }
   0x2   :  { %9 = vsyncpa [#allocation4], 0 }
   0x3   :  { %11 = vsyncpa [#allocation4 + $0x1], 0 }
   0x4   :  { %12 = vsyncpa [#allocation6], 0 }
   0x5   :  { %14 = vsyncpa [#allocation6 + $0x1], 0  ;;  %s808_s15 = smov 0   ;;  %s810_s16 = smov 0  }
   0x6   :  { %s812_s17 = smov 0   ;;  %s814_s18 = smov 0  }
   0x7   :  { %s816_s19 = smov 0   ;;  %s818_s20 = smov 0  }
   0x8   :  { %s820_s21 = smov 0   ;;  %s822_s22 = smov 0  }
   0x9 LB: > { %s538_s23 = sadd.s32 4294967295, %s776_s22   ;;  %s29_s24 = sadd.s32 1, %s768_s20  ;;  %s776_s22 = sphi %s822_s22, %s20_s22   ;;  %s772_s21 = sphi %s820_s21, %s1011_s21   ;;  %s768_s20 = sphi %s818_s20, %s1010_s20   ;;  %s764_s19 = sphi %s816_s19, %s1009_s19   ;;  %s760_s18 = sphi %s814_s18, %s1008_s18   ;;  %s756_s17 = sphi %s812_s17, %s1007_s17   ;;  %s752_s16 = sphi %s810_s16, %s1006_s16   ;;  %s748_s15 = sphi %s808_s15, %s1005_s15  }
   0xa   : > { %p30_p0 = scmp.ge.s32.totalorder %s29_s24, 2  ;;  %s32_s25 = sadd.s32 1, %s772_s21 }
   0xb   : > { %s540_s26 = sshll.u32 %s772_s21, 1  ;;  %s68_s27 = sadd.s32 1, %s756_s17 }
   0xc   : > { %s1013_s24 = smov (%p30_p0, %s29_s24), 0  ;;  %s1015_s25 = smov (!%p30_p0, %s32_s25), %s772_s21 }
   0xd   : > { %s58_s28 = sadd.s32 %s768_s20, %s540_s26  ;;  %p75_p1 = scmp.ne.s32.totalorder %s756_s17, %s752_s16 }
   0xe   : > { %p34_p2 = scmp.ge.s32.totalorder %s1015_s25, 2  ;;  %p59_p3 = scmp.lt.s32.totalorder %s58_s28, 3 }
   0xf   : > { %p76_p4 = scmp.eq.s32.totalorder %s776_s22, 0  ;;  %p81_p5 = scmp.ne.s32.totalorder %s752_s16, %s748_s15 }
  0x10   : > { %s1017_s25 = smov (%p34_p2, %s1015_s25), 0  ;;  %s1019_s28 = smov (!%p59_p3, %s58_s28), 3 }
  0x11   : > { %s541_s29 = sshll.u32 %s1017_s25, 1  ;;  %p864_p6 = por %p76_p4, %p75_p1 }
  0x12   : > { %s62_s5 = sadd.s32 %s541_s29, %s1013_s24  ;;  %p82_p7 = scmp.eq.s32.totalorder %s538_s23, 0 }
  0x13   : > { %p63_p8 = scmp.lt.s32.totalorder %s62_s5, 3  ;;  %p580_p10 = scmp.lt.s32.totalorder %s776_s22, 4 }
  0x14   : > { %p869_p9 = por %p82_p7, %p81_p5  ;;  %s875_s7 = sand.u32 1, %s756_s17  }
  0x15   : > { %s1021_s5 = smov (!%p63_p8, %s62_s5), 3  ;;  %s567_s8 = sshll.u32 %s1019_s28, 8 }
  0x16   : > { %s65_s9 = ssub.s32 %s1019_s28, %s1021_s5  ;;  %s548_s10 = sshll.u32 %s875_s7, 4 }
  0x17   : > { %p66_p11 = scmp.eq.s32.totalorder %s65_s9, 0  ;;  %s1002_s1 = sld [smem:[#allocation9_spill]] }
  0x18   : > { %s206_s15 = scalar_lea.vmem [#allocation3], %s548_s10  ;;  %p890_p12 = pnand %p580_p10, %p864_p6 }
  0x19   : > { %s886_s14 = scalar_select %p66_p11, %s756_s17, %s68_s27  }
  0x1a   : > { %s218_s23 = sshll.u32 %s206_s15, 4  ;;  %p556_p13 = scmp.ge.s32.totalorder %s776_s22, 1  ;;  %s219_s23 = int_to_ptr.vmem [resolvable:$true] %s218_s23 }
  0x1b   : > { %p262_p0 = scmp.lt.s32.totalorder %s776_s22, 5  ;;  %s203_s29 = scalar_lea.sflag [#allocation4], %s875_s7 }
  0x1c   : > { %p652_p1 = pneg %p890_p12  ;;  %s663_s5 = scalar_lea.vmem %s219_s23, 256 }
  0x1d   : > { %s216_s13 = scalar_lea.hbm %s1002_s1, %s567_s8  ;;  %p664_p2 = scmp.ne.s32.totalorder %s219_s23, %s663_s5 }
  0x1e   : > { %s778_s27 = smov [#allocation3]  }
  0x1f   : > { %p666_p3 = pnand %p664_p2, %p652_p1  ;;  %s668_s30 = sshll.u32 %s778_s27, 4  ;;  %s669_s30 = int_to_ptr.vmem [resolvable:$false] %s668_s30 }
  0x20   : > { %s670_s9 = scalar_lea.vmem %s669_s30, 512  ;;  %p671_p5 = scmp.lt.s32.totalorder %s219_s23, %s669_s30 }
  0x21   : > { %p667_p4 = pneg %p666_p3  ;;  %p672_p6 = scmp.lt.s32.totalorder %s670_s9, %s663_s5 }
  0x23   : > { %p673_p7 = por %p672_p6, %p671_p5 }
  0x25   : > { %p674_p8 = pnand %p673_p7, %p667_p4 }
  0x27   : > { %677 = shalt.err (!%p674_p8)
}
  0x28   : > { %576 = dma.hbm_to_vmem [thread:$0]  (!%p890_p12), %s216_s13, 256, %s219_s23, %s203_s29  }
  0x29   : > { %p908_p10 = pnand %p556_p13, %p262_p0  ;;  %s239_s5 = scalar_lea.hbm %s996_s2, %s567_s8 }
  0x2a   : > { %s229_s27 = scalar_lea.vmem [#allocation5], %s548_s10  ;;  %s226_s9 = scalar_lea.sflag [#allocation6], %s875_s7 }
  0x2b   : > { %s241_s30 = sshll.u32 %s229_s27, 4  ;;  %s779_s13 = smov [#allocation5]   ;;  %s242_s30 = int_to_ptr.vmem [resolvable:$true] %s241_s30 }
  0x2c   : > { %s691_s1 = scalar_lea.vmem %s242_s30, 256  ;;  %s696_s23 = sshll.u32 %s779_s13, 4  ;;  %s697_s23 = int_to_ptr.vmem [resolvable:$false] %s696_s23 }
  0x2d   : > { %p692_p11 = scmp.ne.s32.totalorder %s242_s30, %s691_s1  ;;  %s698_s29 = scalar_lea.vmem %s697_s23, 512 }
  0x2e   : > { %p699_p13 = scmp.lt.s32.totalorder %s242_s30, %s697_s23  ;;  %p700_p0 = scmp.lt.s32.totalorder %s698_s29, %s691_s1 }
  0x2f   : > { %p694_p2 = pnand %p692_p11, %p652_p1 }
  0x30   : > { %p701_p4 = por %p700_p0, %p699_p13 }
  0x31   : > { %p695_p3 = pneg %p694_p2 }
  0x33   : > { %p702_p5 = pnand %p701_p4, %p695_p3 }
  0x35   : > { %705 = shalt.err (!%p702_p5)
}
  0x36   : > { %579 = dma.hbm_to_vmem [thread:$0]  (!%p890_p12), %s239_s5, 256, %s242_s30, %s226_s9  }
  0x37   : > { %266 = sbr.rel (%p908_p10) target bundleno = 502 (0x1f6), region = 36  ;;  %s268_s28 = sand.u32 (!%p908_p10), 1, %s752_s16  }
  0x38   : > { %s557_s7 = sshll.u32 (!%p908_p10), %s268_s28, 4  ;;  %s269_s8 = scalar_lea.sflag (!%p908_p10), [#allocation4], %s268_s28 }
  0x39   : > { %s272_s10 = scalar_lea.vmem (!%p908_p10), [#allocation3], %s557_s7 }
  0x3c   : > { %739 = dma.done.wait (%p869_p9), %s269_s8, 256  }
  0x3d   : > { %741 = vsyncadd (%p869_p9), %s269_s8, 4294967040  ;;  %s278_s1 = scalar_lea.sflag [#allocation6], %s268_s28  ;;  %s281_s12 = scalar_lea.vmem [#allocation5], %s557_s7 }
  0x3e   : > { %743 = dma.done.wait (%p869_p9), %s278_s1, 256  }
  0x3f   : > { %745 = vsyncadd (%p869_p9), %s278_s1, 4294967040  ;;  %s559_s26 = sshll.u32 %s764_s19, 1  ;;  %p340_p12 = scmp.lt.s32.totalorder %s764_s19, 1 }
  0x40   : > { %s937_s11 = sadd.s32 %s760_s18, %s559_s26  ;;  %p561_p6 = scmp.ne.s32.totalorder %s760_s18, 0 }
  0x41   : > { %p329_p1 = scmp.lt.s32.totalorder %s937_s11, 3  ;;  %s1023_s19 = smov (!%p340_p12, %s764_s19), 1 }
  0x42   : > { %s342_s6 = scalar_lea.vmem %s998_s4, %s1023_s19 }
  0x43   : > { %s330_s15 = scalar_select %p329_p1, %s937_s11, 3 }
  0x45   : > { %s560_s30 = sshll.u32 %s330_s15, 1  ;;  %346 = sbr.rel (%p561_p6) target bundleno = 76 (0x4c), region = 48 }
  0x46   : > { %p332_p9 = scmp.lt.s32.totalorder %s560_s30, 7 }
  0x48   : > { %s1025_s30 = smov (!%p332_p9, %s560_s30), 7 }
  0x49   : > { %s334_s23 = scalar_lea.vmem %s997_s3, %s1025_s30 }
  0x4a   : > { %vm347_vm0 = vcmask 0   ;;  %v780_v0 = vmov 0.0  }
  0x4b   : > { %348 = vst.msk [vmem:[#allocation2] sm:$0x1] %vm347_vm0, %v780_v0 }
  0x4c PF: > { %v357_v1 = vld [vmem:[%s994_s0] sm:$0x1f]  ;;  %v781_v2 = vmov 0   ;;  %v350_v4 = vld [vmem:[%s272_s10 + $0x8] sm:$0x1f]  ;;  %vm367_vm1 = vcmask 1044480   ;;  %v384_v14 = vlaneseq }
  0x4d   : > { %648 = vset.pattern.permute.xlu0 %v781_v2  ;;  %v349_v3 = vld [vmem:[%s272_s10] sm:$0x1f]  ;;  %v352_v6 = vld [vmem:[%s281_s12 + $0x8] sm:$0x1f]  ;;  %s563_s7 = sshll.u32 %s937_s11, 8  ;;  %vm412_vm4 = vcmask 1040384  }
  0x4e   : > { %360 = vperm.xlu0 %648, %v357_v1   ;;  %v351_v5 = vld [vmem:[%s281_s12] sm:$0x1f]  ;;  %v354_v8 = vsub.f32 %v350_v4, %v352_v6  ;;  %v385_v21 = vshrl.u32 %v384_v14, 7  ;;  %v402_v22 = vand.u32 127, %v384_v14  ;;  %v404_v33 = vstv %s563_s7  ;;  %p564_p7 = scmp.ne.s32.totalorder %s760_s18, 1 }
  0x4f   : > { %v353_v7 = vsub.f32 %v349_v3, %v351_v5  ;;  %v382_v29 = vld [vmem:[%s334_s23] sm:$0x3]  ;;  %vm419_vm5 = vcmask 0  }
  0x50   : > { %v356_v10 = vmax.f32 %v354_v8, 0.0  ;;  %v386_v27 = vsub.s32 0, %v385_v21  ;;  %v390_v28 = vsub.s32 1, %v385_v21  ;;  %v403_v30 = vadd.s32 128, %v402_v22 }
  0x51   : > { %v355_v9 = vmax.f32 %v353_v7, 0.0  ;;  %v405_v38 = vadd.s32 %v404_v33, %v402_v22 }
  0x52   : > { %v387_v36 = vrot.slane %v382_v29, %v386_v27  ;;  %v391_v37 = vrot.slane %v382_v29, %v390_v28  ;;  %v406_v39 = vadd.s32 %v404_v33, %v403_v30  ;;  %v411_v51 = vld [vmem:[#allocation2] sm:$0x1] }
  0x53   : > { %vm407_vm2 = vcmp.lt.s32.totalorder %v405_v38, 1000 }
  0x54   : > { %vm408_vm3 = vcmp.lt.s32.totalorder %v406_v39, 1000 }
  0xc9   : > { %v361_v11 = vpop.permute.xlu0 %360 }
  0xca   : > { %v363_v12 = vmul.f32 %v361_v11, %v351_v5  ;;  %v364_v13 = vmul.f32 %v361_v11, %v352_v6 }
  0xcc   : > { %v365_v15 = vadd.f32 %v363_v12, %v355_v9  ;;  %v366_v16 = vadd.f32 %v364_v13, %v356_v10 }
  0xce   : > { %v368_v17 = vsel %vm367_vm1, %v365_v15, 0.0  ;;  %v375_v18 = vsel %vm367_vm1, %v366_v16, 0.0 }
  0xcf   : > { %v369_v19 = vrot.slane %v368_v17, 4  ;;  %v376_v20 = vrot.slane %v375_v18, 4 }
  0xd1   : > { %v370_v23 = vadd.f32 %v369_v19, %v368_v17  ;;  %v377_v24 = vadd.f32 %v376_v20, %v375_v18 }
  0xd3   : > { %v371_v25 = vrot.slane %v370_v23, 2  ;;  %v378_v26 = vrot.slane %v377_v24, 2 }
  0xd5   : > { %v372_v31 = vadd.f32 %v371_v25, %v370_v23  ;;  %v379_v32 = vadd.f32 %v378_v26, %v377_v24 }
  0xd7   : > { %v373_v34 = vrot.slane %v372_v31, 1  ;;  %v380_v35 = vrot.slane %v379_v32, 1 }
  0xd9   : > { %v374_v40 = vadd.f32 %v373_v34, %v372_v31  ;;  %v381_v41 = vadd.f32 %v380_v35, %v379_v32 }
  0xdb   : > { %v394_v42 = vsub.f32 %v374_v40, %v387_v36  ;;  %v395_v43 = vsub.f32 %v381_v41, %v391_v37 }
  0xdd   : > { %v396_v44 = vand.u32 2147483647, %v394_v42  ;;  %v397_v45 = vand.u32 2147483647, %v395_v43 }
  0xdf   : > { %v409_v46 = vsel %vm407_vm2, %v396_v44, 0.0  ;;  %v410_v47 = vsel %vm408_vm3, %v397_v45, 0.0 }
  0xe0   : > { %v413_v48 = vsel %vm412_vm4, %v409_v46, 0.0  ;;  %v414_v49 = vsel %vm412_vm4, %v410_v47, 0.0 }
  0xe1   : > { %v415_v50 = vadd.f32 %v414_v49, %v413_v48 }
  0xe3   : > { %416 = vadd.xlane.f32.xlu0 %v415_v50 }
 0x16b   : > { %424 = sbr.rel (%p564_p7) target bundleno = 502 (0x1f6), region = 52 }
 0x16c   : > { %v417_v52 = vpop.xlane.xlu0 %416 }
 0x16d   : > { %v418_v53 = vadd.f32 %v417_v52, %v411_v51 }
 0x16f   : > { %420 = vst.msk [vmem:[#allocation2] sm:$0x1] %vm419_vm5, %v418_v53 }
 0x170   : > { %v782_v55 = vmov 0  }
 0x171   : > { %649 = vset.pattern.permute.xlu0 %v782_v55 }
 0x176   : > { %v425_v54 = vld [vmem:[#allocation2] sm:$0x1] }
 0x177   : > { %428 = vperm.xlu0 %649, %v425_v54  }
 0x1f2   : > { %v429_v56 = vpop.permute.xlu0 %428 }
 0x1f3   : > { %v434_v57 = vrot.slane %v429_v56, %v386_v27 }
 0x1f5   : > { %435 = vst [vmem:[%s342_s6] sm:$0x1] %v434_v57 }
 0x1f6 PF: > { %s20_s22 = sadd.s32 1, %s776_s22   ;;  %s1005_s15 = smov %s752_s16 }
 0x1f7   : > { %p17_p8 = scmp.ge.s32.totalorder %s20_s22, 6   ;;  %s1006_s16 = smov %s756_s17 }
 0x1f8   : > { %s1007_s17 = smov %s886_s14  ;;  %s1008_s18 = smov %s768_s20 }
 0x1f9   : > { %s1009_s19 = smov %s772_s21  ;;  %s1010_s20 = smov %s1013_s24 }
 0x1fa   : > { %s1011_s21 = smov %s1017_s25  ;;  %19 = sbr.rel (!%p17_p8) target bundleno = 9 (0x9), region = 100 }
 0x1ff   :  { %453 = vsyncpa [#allocation4], 1 }
 0x200   :  { %455 = vsyncpa [#allocation4 + $0x1], 1 }
 0x201   :  { %456 = vsyncpa [#allocation6], 1 }
 0x202   :  { %458 = vsyncpa [#allocation6 + $0x1], 1 }

</bundles_post_ra>
